<compile_context>
chip_gen: v5e
topology: v5e:2x2
jax: 0.10.0
libtpu: 0.0.40
codegen_flags: <defaults>
</compile_context>

<pallas_src>
import functools
import math

import jax
import jax.numpy as jnp
from jax.experimental import pallas as pl
from jax.experimental.pallas import tpu as pltpu


# ----------------------------------------------------------------------------
# Tiling helpers / compiler params
# ----------------------------------------------------------------------------
_VMEM_LIMIT_BYTES = 48 * 1024 * 1024  # leaves headroom under v7x's 64 MiB


def _cparams(dims):
    return pltpu.CompilerParams(dimension_semantics=dims,
                                vmem_limit_bytes=_VMEM_LIMIT_BYTES)


def _round_up(x, m):
    return ((x + m - 1) // m) * m


def _row_tile(m, pref=256):
    """Fixed row tile (ragged tail handled by Pallas via cdiv)."""
    return pref if m > pref else m


def _k_tile(k):
    """K tile must divide K exactly (a ragged reduction block would feed
    undefined padded data into the accumulator)."""
    for t in (512, 256, 128):
        if k % t == 0:
            return t
    return k


# ----------------------------------------------------------------------------
# Kernels
# ----------------------------------------------------------------------------
def _linear_kernel(x_ref, w_ref, b_ref, o_ref, acc_ref, *, activation):
    """o = act(x @ w + b), tiled over (M, N, K) with f32 accumulation.

    x arrives in whatever dtype the caller holds (f32 user input) and is cast
    to bf16 in-register -> native MXU path without a wrapper-side HBM cast.
    """
    @pl.when(pl.program_id(2) == 0)
    def _():
        acc_ref[...] = jnp.zeros_like(acc_ref)

    acc_ref[...] += jnp.dot(
        x_ref[...].astype(jnp.bfloat16),
        w_ref[...].astype(jnp.bfloat16),
        preferred_element_type=jnp.float32)

    @pl.when(pl.program_id(2) == pl.num_programs(2) - 1)
    def _():
        acc = acc_ref[...] + b_ref[...]
        if activation == "relu":
            acc = jnp.maximum(acc, 0.0)
        elif activation == "tanh":
            acc = jnp.tanh(acc)
        o_ref[...] = acc.astype(o_ref.dtype)


def _go_term_kernel(x_ref, w1_ref, b1_ref, wa1_ref, ba1_ref, w2_ref, b2_ref,
                    y_ref, aux_ref):
    """Per-(term, row-tile) fused GO chain:

        y   = tanh(x_t @ W1_t + b1_t)
        a1  = tanh(y  @ Wa1_t + ba1_t)
        aux = a1 * w2_t + b2_t

    Weights are the real per-term panels (no block-diagonal zeros); the
    intermediates never leave the kernel.
    """
    x = x_ref[0].astype(jnp.bfloat16)                       # (tm, K_pad)
    y = jnp.dot(x, w1_ref[0], preferred_element_type=jnp.float32)
    y = jnp.tanh(y + b1_ref[0])                             # f32 epilogue
    y_bf = y.astype(jnp.bfloat16)                           # bf16 MXU aux dot
    a1 = jnp.dot(y_bf, wa1_ref[0], preferred_element_type=jnp.float32)
    a1 = jnp.tanh(a1 + ba1_ref[0])
    aux_ref[0] = a1 * w2_ref[0] + b2_ref[0]
    y_ref[0] = y.astype(y_ref.dtype)


def _gcn_kernel(adj_ref, x_ref, w_ref, o_ref, sup_ref):
    """relu(adj @ (x @ W)) in one launch: support is computed once (grid step
    0) into VMEM scratch and reused by every adjacency row tile."""
    @pl.when(pl.program_id(0) == 0)
    def _():
        sup = jnp.dot(x_ref[...].astype(jnp.bfloat16),
                      w_ref[...].astype(jnp.bfloat16),
                      preferred_element_type=jnp.float32)
        sup_ref[...] = sup.astype(jnp.bfloat16)

    out = jnp.dot(adj_ref[...].astype(jnp.bfloat16), sup_ref[...],
                  preferred_element_type=jnp.float32)
    o_ref[...] = jnp.maximum(out, 0.0).astype(o_ref.dtype)


# ----------------------------------------------------------------------------
# Wrappers
# ----------------------------------------------------------------------------
def pallas_linear(x, w, b, activation="none", out_dtype=jnp.bfloat16):
    """act(x @ w + b).  x:(M,K) any float dtype, w:(K,N) bf16, b:(1,N) f32."""
    m, k = x.shape
    k2, n = w.shape
    assert k == k2
    tm = _row_tile(m)
    tn = 512 if n > 512 else n
    tk = _k_tile(k)

    kern = functools.partial(_linear_kernel, activation=activation)
    return pl.pallas_call(
        kern,
        grid=(pl.cdiv(m, tm), pl.cdiv(n, tn), k // tk),
        in_specs=[
            pl.BlockSpec((tm, tk), lambda i, j, kk: (i, kk)),
            pl.BlockSpec((tk, tn), lambda i, j, kk: (kk, j)),
            pl.BlockSpec((1, tn), lambda i, j, kk: (0, j)),
        ],
        out_specs=pl.BlockSpec((tm, tn), lambda i, j, kk: (i, j)),
        out_shape=jax.ShapeDtypeStruct((m, n), out_dtype),
        scratch_shapes=[pltpu.VMEM((tm, tn), jnp.float32)],
        compiler_params=_cparams(("parallel", "parallel", "arbitrary")),
    )(x, w, b)


def pallas_go_layer(x_slab, w1, b1, wa1, ba1, w2, b2, *, out_dtype):
    """Fused per-term GO layer.  x_slab:(T, M, K_pad), w1:(T, K_pad, H) bf16.

    Returns y:(T, M, H) in `out_dtype` and aux:(T, M, 1) f32.
    """
    t, m, kpad = x_slab.shape
    h = w1.shape[-1]
    tm = _row_tile(m)

    # TODO(synk): pack all terms' aux columns into one lane-dense output slab
    # (the (1, tm, 1) aux block lowers to a masked narrow store).
    return pl.pallas_call(
        _go_term_kernel,
        grid=(t, pl.cdiv(m, tm)),
        in_specs=[
            pl.BlockSpec((1, tm, kpad), lambda ti, ri: (ti, ri, 0)),
            pl.BlockSpec((1, kpad, h), lambda ti, ri: (ti, 0, 0)),
            pl.BlockSpec((1, 1, h), lambda ti, ri: (ti, 0, 0)),
            pl.BlockSpec((1, h, 1), lambda ti, ri: (ti, 0, 0)),
            pl.BlockSpec((1, 1, 1), lambda ti, ri: (ti, 0, 0)),
            pl.BlockSpec((1, 1, 1), lambda ti, ri: (ti, 0, 0)),
            pl.BlockSpec((1, 1, 1), lambda ti, ri: (ti, 0, 0)),
        ],
        out_specs=(
            pl.BlockSpec((1, tm, h), lambda ti, ri: (ti, ri, 0)),
            pl.BlockSpec((1, tm, 1), lambda ti, ri: (ti, ri, 0)),
        ),
        out_shape=(
            jax.ShapeDtypeStruct((t, m, h), out_dtype),
            jax.ShapeDtypeStruct((t, m, 1), jnp.float32),
        ),
        compiler_params=_cparams(("parallel", "parallel")),
    )(x_slab, w1, b1, wa1, ba1, w2, b2)


def pallas_gcn_layer(adj, x, w, out_dtype=jnp.bfloat16):
    """One fused launch for relu(adj @ (x @ W)).  adj:(R,N), x:(N,K), w:(K,H)."""
    r, n = adj.shape
    n2, k = x.shape
    assert n == n2
    k2, h = w.shape
    assert k == k2
    tm = _row_tile(r)

    # TODO(synk): if the adjacency is guaranteed per-molecule block-diagonal,
    # grid over molecules with (atom_num, atom_num) blocks instead of dense adj.
    return pl.pallas_call(
        _gcn_kernel,
        grid=(pl.cdiv(r, tm),),
        in_specs=[
            pl.BlockSpec((tm, n), lambda i: (i, 0)),
            pl.BlockSpec((n, k), lambda i: (0, 0)),
            pl.BlockSpec((k, h), lambda i: (0, 0)),
        ],
        out_specs=pl.BlockSpec((tm, h), lambda i: (i, 0)),
        out_shape=jax.ShapeDtypeStruct((r, h), out_dtype),
        scratch_shapes=[pltpu.VMEM((n, h), jnp.bfloat16)],
        # scratch init at step 0 is reused by later row tiles -> sequential grid
        compiler_params=_cparams(("arbitrary",)),
    )(adj, x, w)


# ----------------------------------------------------------------------------
# Deterministic parameter construction (mirrors drugcell_graph.__init__ shapes)
# ----------------------------------------------------------------------------
def init_linear_params(key, in_f, out_f):
    kw, kb = jax.random.split(key)
    bound = 1.0 / math.sqrt(in_f)
    w = jax.random.uniform(kw, (in_f, out_f), jnp.float32, -bound, bound)
    b = jax.random.uniform(kb, (out_f,), jnp.float32, -bound, bound)
    return w, b


def init_gcn_weight(key, in_f, out_f):
    stdv = 1.0 / math.sqrt(out_f)
    return jax.random.uniform(key, (in_f, out_f), jnp.float32, -stdv, stdv)


class DrugCellGraphPallas:
    """Synthetic, deterministic instantiation of drugcell_graph (drug_graph='gcn')."""

    def __init__(self, key, *, gene_dim, ndrug, atom_num, batch_size,
                 num_hiddens_genotype, num_hiddens_drug, num_hiddens_final):
        self.gene_dim = gene_dim
        self.drug_dim = ndrug
        self.atom_num = atom_num
        self.batch_size = batch_size
        self.H = num_hiddens_genotype
        self.num_hiddens_drug = num_hiddens_drug
        self.num_hiddens_final = num_hiddens_final

        # Small synthetic GO hierarchy (construct_NN_graph result):
        #   root GO:A -> children GO:B, GO:C (leaves)
        self.root = "GO:A"
        self.children_map = {"GO:A": ["GO:B", "GO:C"], "GO:B": [], "GO:C": []}
        self.term_layer_list = [["GO:B", "GO:C"], ["GO:A"]]
        self.direct_gene_sizes = {"GO:B": 4, "GO:C": 6, "GO:A": 3}

        kid = 0

        def nk():
            nonlocal kid
            kid += 1
            return jax.random.fold_in(key, kid)

        # ---- batched direct-gene linears: one (gene_dim, sum ngenes) matmul ----
        dg_w, dg_b = [], []
        self.dg_slices = {}
        off = 0
        for term, ngenes in self.direct_gene_sizes.items():
            w, b = init_linear_params(nk(), gene_dim, ngenes)
            dg_w.append(w)
            dg_b.append(b)
            self.dg_slices[term] = (off, ngenes)
            off += ngenes
        self.dg_weight = jnp.concatenate(dg_w, axis=1).astype(jnp.bfloat16)
        self.dg_bias = jnp.concatenate(dg_b).reshape(1, -1).astype(jnp.float32)

        # ---- per GO layer: per-term stacked params (T, K_pad, H) etc. ----
        # (batchnorm layers exist in the torch module but are never used in
        #  forward, so they are not materialized)
        H = self.H
        self.layer_params = []
        for layer in self.term_layer_list:
            in_sizes = []
            for term in layer:
                s = H * len(self.children_map[term])
                if term in self.direct_gene_sizes:
                    s += self.direct_gene_sizes[term]
                in_sizes.append(s)
            kpad = _round_up(max(in_sizes), 128)

            w1s, b1s, wa1s, ba1s, w2s, b2s = [], [], [], [], [], []
            for term, s in zip(layer, in_sizes):
                w, b = init_linear_params(nk(), s, H)          # _linear_layer
                w1s.append(jnp.pad(w, ((0, kpad - s), (0, 0))))
                b1s.append(b.reshape(1, H))
                wa, ba = init_linear_params(nk(), H, 1)        # _aux_linear_layer1
                wa1s.append(wa)
                ba1s.append(ba.reshape(1, 1))
                w2, b2 = init_linear_params(nk(), 1, 1)        # _aux_linear_layer2
                w2s.append(w2.reshape(1, 1))
                b2s.append(b2.reshape(1, 1))
            self.layer_params.append(dict(
                kpad=kpad,
                w1=jnp.stack(w1s).astype(jnp.bfloat16),        # (T, kpad, H)
                b1=jnp.stack(b1s),                             # (T, 1, H) f32
                wa1=jnp.stack(wa1s).astype(jnp.bfloat16),      # (T, H, 1)
                ba1=jnp.stack(ba1s),                           # (T, 1, 1)
                w2=jnp.stack(w2s),                             # (T, 1, 1)
                b2=jnp.stack(b2s),                             # (T, 1, 1)
            ))

        # ---- drug GCN layers: input_size starts at drug_dim * batch_size ----
        gcn_ws = []
        in_size = ndrug * batch_size
        for h in num_hiddens_drug:
            gcn_ws.append(init_gcn_weight(nk(), in_size, h).astype(jnp.bfloat16))
            in_size = h
        self.gcn_weights = gcn_ws
        # drug_linear_layer exists in __init__ but is unused in forward -> skipped.

        # ---- fused final block: final_linear + final_aux + final_out (T=1) ----
        final_in = H + num_hiddens_drug[-1]
        kpad_f = _round_up(final_in, 128)
        w, b = init_linear_params(nk(), final_in, num_hiddens_final)
        wa, ba = init_linear_params(nk(), num_hiddens_final, 1)
        w2, b2 = init_linear_params(nk(), 1, 1)
        self.final_params = dict(
            kpad=kpad_f,
            w1=jnp.pad(w, ((0, kpad_f - final_in), (0, 0)))[None].astype(jnp.bfloat16),
            b1=b.reshape(1, 1, num_hiddens_final),
            wa1=wa[None].astype(jnp.bfloat16),
            ba1=ba.reshape(1, 1, 1),
            w2=w2.reshape(1, 1, 1),
            b2=b2.reshape(1, 1, 1),
        )

    # ------------------------------------------------------------------
    def forward(self, gene_input, drug_input, drug_adj):
        # one batched launch for every term's direct-gene layer (bf16 output,
        # consumed directly by the GO-layer slabs)
        gene_out_all = pallas_linear(gene_input, self.dg_weight, self.dg_bias,
                                     activation="none", out_dtype=jnp.bfloat16)
        term_gene_out = {t: gene_out_all[:, o:o + n]
                         for t, (o, n) in self.dg_slices.items()}

        term_NN_out = {}
        aux_out = {}
        # one fused launch per GO layer, per-term grid inside the kernel
        for layer, params in zip(self.term_layer_list, self.layer_params):
            kpad = params["kpad"]
            # TODO(synk): at production sizes gather the per-term input columns
            # inside the kernel via scalar-prefetched offsets instead of this
            # wrapper-side concat/pad/stack.
            slabs = []
            for term in layer:
                cols = [term_NN_out[c] for c in self.children_map[term]]
                if term in self.direct_gene_sizes:
                    cols.append(term_gene_out[term])
                x_t = jnp.concatenate(cols, axis=1) if len(cols) > 1 else cols[0]
                pad = kpad - x_t.shape[1]
                if pad:
                    x_t = jnp.pad(x_t, ((0, 0), (0, pad)))
                slabs.append(x_t)
            x_slab = jnp.stack(slabs, axis=0)                  # (T, M, kpad) bf16

            y, aux = pallas_go_layer(
                x_slab, params["w1"], params["b1"], params["wa1"],
                params["ba1"], params["w2"], params["b2"],
                out_dtype=jnp.bfloat16)
            for ti, term in enumerate(layer):
                term_NN_out[term] = y[ti]                      # (M, H) bf16
                aux_out[term] = aux[ti]                        # (M, 1) f32

        # drug branch: each GCN layer is one fused launch relu(adj @ (x @ W)).
        # The LAST layer only computes the rows consumed by drug_graph_reshape
        # (rows i*atom_num) by slicing the adjacency rows with stride atom_num.
        drug_out = drug_input
        n_layers = len(self.gcn_weights)
        for li, w in enumerate(self.gcn_weights):
            adj_used = drug_adj[::self.atom_num] if li == n_layers - 1 else drug_adj
            drug_out = pallas_gcn_layer(adj_used, drug_out, w,
                                        out_dtype=jnp.bfloat16)

        # drug_graph_reshape: row i*atom_num is tiled over atoms then summed
        #                     == that row scaled by atom_num (matches torch ref)
        drug_reshape = drug_out * float(self.atom_num)         # (batch, Hd) bf16

        # fused final block (same per-term kernel, T=1); outputs stay f32
        fp = self.final_params
        final_cols = jnp.concatenate([term_NN_out[self.root], drug_reshape],
                                     axis=1)
        pad = fp["kpad"] - final_cols.shape[1]
        if pad:
            final_cols = jnp.pad(final_cols, ((0, 0), (0, pad)))
        out, aux_final = pallas_go_layer(
            final_cols[None], fp["w1"], fp["b1"], fp["wa1"], fp["ba1"],
            fp["w2"], fp["b2"], out_dtype=jnp.float32)
        term_NN_out["final"] = out[0]
        aux_out["final"] = aux_final[0]
        return aux_out, term_NN_out


# ----------------------------------------------------------------------------
if __name__ == "__main__":
    key = jax.random.PRNGKey(0)

    batch_size = 2
    gene_dim = 16          # ngene
    ndrug = 3              # drug_dim
    atom_num = 4           # natom
    H_geno = 8             # num_hiddens_genotype
    H_drug = [12, 10]      # num_hiddens_drug
    H_final = 16           # num_hiddens_final

    model = DrugCellGraphPallas(
        jax.random.fold_in(key, 1000),
        gene_dim=gene_dim, ndrug=ndrug, atom_num=atom_num, batch_size=batch_size,
        num_hiddens_genotype=H_geno, num_hiddens_drug=H_drug,
        num_hiddens_final=H_final,
    )

    k1, k2, k3 = jax.random.split(key, 3)
    gene_input = jax.random.normal(k1, (batch_size, gene_dim), jnp.float32)
    n_nodes = batch_size * atom_num
    drug_input = jax.random.normal(k2, (n_nodes, ndrug * batch_size), jnp.float32)
    drug_adj = (jax.random.uniform(k3, (n_nodes, n_nodes)) > 0.5).astype(jnp.float32)

    aux_out_map, term_NN_out_map = model.forward(gene_input, drug_input, drug_adj)

    jax.block_until_ready(aux_out_map["final"])
    jax.block_until_ready(term_NN_out_map["final"])

    assert aux_out_map["final"].shape == (batch_size, 1)
    assert term_NN_out_map["final"].shape == (batch_size, H_final)
    assert bool(jnp.all(jnp.isfinite(term_NN_out_map["final"])))
    assert bool(jnp.all(jnp.isfinite(aux_out_map["final"])))
    for layer in model.term_layer_list:
        for term in layer:
            assert term_NN_out_map[term].shape == (batch_size, H_geno)
            assert aux_out_map[term].shape == (batch_size, 1)
            assert bool(jnp.all(jnp.isfinite(aux_out_map[term].astype(jnp.float32))))
    print("KERNEL_OK")
</pallas_src>

<mosaic_0001>
module attributes {stable_mosaic.version = 11 : i64} {
  func.func @_linear_kernel(%arg0: i32, %arg1: i32, %arg2: i32, %arg3: memref<2x16xf32, #tpu.memory_space<vmem>>, %arg4: memref<16x13xbf16, #tpu.memory_space<vmem>>, %arg5: memref<1x13xf32, #tpu.memory_space<vmem>>, %arg6: memref<2x13xbf16, #tpu.memory_space<vmem>>, %arg7: memref<2x13xf32, #tpu.memory_space<vmem>>) attributes {dimension_semantics = [#tpu.dimension_semantics<parallel>, #tpu.dimension_semantics<parallel>, #tpu.dimension_semantics<arbitrary>], iteration_bounds = array<i64: 1, 1, 1>, scalar_prefetch = 0 : i64, scratch_operands = 1 : i64, tpu.core_type = #tpu.core_type<tc>, window_params = [{transform_indices = @transform_0, window_bounds = array<i64: 2, 16>}, {transform_indices = @transform_1, window_bounds = array<i64: 16, 13>}, {transform_indices = @transform_2, window_bounds = array<i64: 1, 13>}, {transform_indices = @transform_3, window_bounds = array<i64: 2, 13>}]} {
    %c0_i32 = arith.constant 0 : i32
    %0 = arith.cmpi eq, %arg2, %c0_i32 : i32
    %1 = arith.extui %0 : i1 to i32
    %c0_i32_0 = arith.constant 0 : i32
    %2 = arith.cmpi ne, %1, %c0_i32_0 : i32
    scf.if %2 {
      %cst_10 = arith.constant 0.000000e+00 : f32
      %13 = vector.broadcast %cst_10 : f32 to vector<2x13xf32>
      %c0_11 = arith.constant 0 : index
      %c0_12 = arith.constant 0 : index
      %14 = vector.load %arg7[%c0_11, %c0_12] : memref<2x13xf32, #tpu.memory_space<vmem>>, vector<2x13xf32>
      tpu.vector_store %arg7[%c0_11, %c0_12], %13 {strides = array<i32>} : memref<2x13xf32, #tpu.memory_space<vmem>>, vector<2x13xf32>,
    } else {
    }
    %c0 = arith.constant 0 : index
    %c0_1 = arith.constant 0 : index
    %3 = vector.load %arg7[%c0, %c0_1] : memref<2x13xf32, #tpu.memory_space<vmem>>, vector<2x13xf32>
    %c0_2 = arith.constant 0 : index
    %c0_3 = arith.constant 0 : index
    %4 = vector.load %arg3[%c0_2, %c0_3] : memref<2x16xf32, #tpu.memory_space<vmem>>, vector<2x16xf32>
    %5 = arith.truncf %4 : vector<2x16xf32> to vector<2x16xbf16>
    %c0_4 = arith.constant 0 : index
    %c0_5 = arith.constant 0 : index
    %6 = vector.load %arg4[%c0_4, %c0_5] : memref<16x13xbf16, #tpu.memory_space<vmem>>, vector<16x13xbf16>
    %cst = arith.constant dense<0.000000e+00> : vector<2x13xf32>
    %7 = tpu.matmul %5, %6, %cst {dimension_numbers = #tpu.dot_dimension_numbers<[1], [0], [0], [1], [0, 0, 1, 1], [], []>} : vector<2x16xbf16>, vector<16x13xbf16>, vector<2x13xf32> -> vector<2x13xf32>
    %8 = arith.addf %3, %7 : vector<2x13xf32>
    %c0_6 = arith.constant 0 : index
    %c0_7 = arith.constant 0 : index
    %9 = vector.load %arg7[%c0_6, %c0_7] : memref<2x13xf32, #tpu.memory_space<vmem>>, vector<2x13xf32>
    tpu.vector_store %arg7[%c0_6, %c0_7], %8 {strides = array<i32>} : memref<2x13xf32, #tpu.memory_space<vmem>>, vector<2x13xf32>,
    %c0_i32_8 = arith.constant 0 : i32
    %10 = arith.cmpi eq, %arg2, %c0_i32_8 : i32
    %11 = arith.extui %10 : i1 to i32
    %c0_i32_9 = arith.constant 0 : i32
    %12 = arith.cmpi ne, %11, %c0_i32_9 : i32
    scf.if %12 {
      %c0_10 = arith.constant 0 : index
      %c0_11 = arith.constant 0 : index
      %13 = vector.load %arg7[%c0_10, %c0_11] : memref<2x13xf32, #tpu.memory_space<vmem>>, vector<2x13xf32>
      %c0_12 = arith.constant 0 : index
      %c0_13 = arith.constant 0 : index
      %14 = vector.load %arg5[%c0_12, %c0_13] : memref<1x13xf32, #tpu.memory_space<vmem>>, vector<1x13xf32>
      %15 = vector.broadcast %14 : vector<1x13xf32> to vector<2x13xf32>
      %16 = arith.addf %13, %15 : vector<2x13xf32>
      %17 = arith.truncf %16 : vector<2x13xf32> to vector<2x13xbf16>
      %c0_14 = arith.constant 0 : index
      %c0_15 = arith.constant 0 : index
      %18 = vector.load %arg6[%c0_14, %c0_15] : memref<2x13xbf16, #tpu.memory_space<vmem>>, vector<2x13xbf16>
      tpu.vector_store %arg6[%c0_14, %c0_15], %17 {strides = array<i32>} : memref<2x13xbf16, #tpu.memory_space<vmem>>, vector<2x13xbf16>,
    } else {
    }
    return
  }
  func.func @transform_0(%arg0: i32, %arg1: i32, %arg2: i32) -> (i32, i32) {
    %c0_i32 = arith.constant 0 : i32
    return %arg0, %arg2 : i32, i32
  }
  func.func @transform_1(%arg0: i32, %arg1: i32, %arg2: i32) -> (i32, i32) {
    %c0_i32 = arith.constant 0 : i32
    return %arg2, %arg1 : i32, i32
  }
  func.func @transform_2(%arg0: i32, %arg1: i32, %arg2: i32) -> (i32, i32) {
    %c0_i32 = arith.constant 0 : i32
    %c0_i32_0 = arith.constant 0 : i32
    return %c0_i32, %arg1 : i32, i32
  }
  func.func @transform_3(%arg0: i32, %arg1: i32, %arg2: i32) -> (i32, i32) {
    %c0_i32 = arith.constant 0 : i32
    return %arg0, %arg1 : i32, i32
  }
}

</mosaic_0001>

<bundles_post_ra>
// kernel: tpu_custom_call.1
= control target key start
LH: loop header
LB: loop body
LE: loop exit
PB: predicated region body
PF: predicated region fallthrough
CT: control target
= control target key end

     0   :  { %8 = vsyncpa [#allocation4], 0  ;;  %s242_s0 = inlined_call_operand.hbm [shape: f32[2,16], index: 0, kind: input, shape index: {}]   ;;  %s243_s1 = inlined_call_operand.hbm [shape: bf16[16,13], index: 1, kind: input, shape index: {}]   ;;  %s244_s2 = inlined_call_operand.vmem [shape: f32[1,13], index: 2, kind: input, shape index: {}]   ;;  %s245_s3 = inlined_call_operand.hbm [shape: bf16[2,13], index: 3, kind: output, shape index: {}]  }
   0x1   :  { %9 = vsyncpa [#allocation7], 0 }
   0x2   :  { %10 = vsyncpa [#allocation5], 0  ;;  %s16_s14 = sshll.u32 %s242_s0, 4  ;;  %s204_s15 = smov [#allocation3]   ;;  %s17_s14 = int_to_ptr.hbm [resolvable:$true] %s16_s14 }
   0x3   :  { %s18_s16 = sshll.u32 %s204_s15, 4  ;;  %s26_s19 = sshll.u32 %s243_s1, 4  ;;  %s19_s16 = int_to_ptr.vmem [resolvable:$true] %s18_s16  ;;  %s27_s19 = int_to_ptr.hbm [resolvable:$true] %s26_s19 }
   0x4   :  { %21 = dma.hbm_to_vmem [thread:$0]  %s17_s14, 32, %s19_s16, [#allocation4]  }
   0x5   :  { %s205_s20 = smov [#allocation6]   ;;  %s206_s22 = smov 64  }
   0x6   :  { %s28_s21 = sshll.u32 %s205_s20, 4  ;;  %s207_s23 = smov 4   ;;  %s29_s21 = int_to_ptr.vmem [resolvable:$true] %s28_s21 }
   0x7   :  { %34 = dma.hbm_to_vmem [thread:$0]  %s27_s19, 128, %s29_s21, [#allocation7], %s206_s22, %s206_s22, %s207_s23  }
   0x8   :  { %198 = dma.done.wait [#allocation4], 32  }
   0x9   :  { %199 = vsyncadd [#allocation4], 4294967264 }
   0xa   :  { %200 = dma.done.wait [#allocation7], 128  }
   0xb   :  { %201 = vsyncadd [#allocation7], 4294967168  ;;  %vm50_vm0 = vcmask 99328   ;;  %v208_v0 = vmov 0.0   ;;  %v118_v1 = vld [vmem:[#allocation6] sm:$0xff]  ;;  %vm63_vm1 = vcmask 130048  }
   0xc   :  { %51 = vst.msk [vmem:[#allocation2] sm:$0x3] %vm50_vm0, %v208_v0  ;;  %v53_v2 = vld [vmem:[#allocation3] sm:$0x3]  ;;  %74 = vmatpush.bf16.msra.mxu0 %v118_v1  ;;  %v125_v7 = vld [vmem:[%s244_s2] ss:$0 sm:$0xff] }
   0xd   :  { %v54_v3 = vpack.c.bf16 %v53_v2, %v53_v2  ;;  %s209_s24 = smov [#allocation8]   ;;  %s102_s28 = sshll.u32 %s245_s3, 4  ;;  %vm93_vm2 = vcmask 98304   ;;  %s103_s28 = int_to_ptr.hbm [resolvable:$true] %s102_s28 }
   0xe   :  { %s100_s25 = sshll.u32 %s209_s24, 4  ;;  %s101_s25 = int_to_ptr.vmem [resolvable:$true] %s100_s25 }
   0xf   :  { %117 = vmatmul.msk.bf16.vlgmr.msra.gmra.mxu0 %vm63_vm1, %v54_v3 }
  0x13   :  { %v52_v4 = vld [vmem:[#allocation2] sm:$0x3] }
  0x8c   :  { %v76_v5 = vpop.f32.mrf.mxu0 }
  0x8d   :  { %v80_v6 = vadd.f32 %v76_v5, %v52_v4 }
  0x8f   :  { %82 = vst.msk [vmem:[#allocation2] sm:$0x3] %vm50_vm0, %v80_v6 }
  0x94   :  { %v78_v8 = vpop.f32.mrf.mxu0 }
  0x96   :  { %v86_v9 = vld [vmem:[#allocation2] sm:$0x3] }
  0x97   :  { %v91_v10 = vadd.f32 %v125_v7, %v86_v9 }
  0x99   :  { %v92_v11 = vpack.c.bf16 %v91_v10, %v91_v10 }
  0x9b   :  { %94 = vst.msk [vmem:[#allocation8] sm:$0x1] %vm93_vm2, %v92_v11 }
  0x9c   :  { %105 = dma.vmem_to_hbm [thread:$0]  %s101_s25, 16, %s103_s28, [#allocation5]  }
  0x9d   :  { %202 = dma.done.wait [#allocation5], 16  }
  0x9e   :  { %203 = vsyncadd [#allocation5], 4294967280 }
  0x9f   :  { %110 = vsyncpa [#allocation4], 1 }
  0xa0   :  { %111 = vsyncpa [#allocation7], 1 }
  0xa1   :  { %112 = vsyncpa [#allocation5], 1 }

</bundles_post_ra>
